<compile_context>
chip_gen: v7x
topology: tpu7x:2x2x1
jax: 0.10.0
libtpu: 0.0.40
codegen_flags: <defaults>
</compile_context>

<pallas_src>
import math
import jax
import jax.numpy as jnp
from jax.experimental import pallas as pl
from jax.experimental.pallas import tpu as pltpu

D_MODEL = 32
N_HEADS = 4
D_HEAD = D_MODEL // N_HEADS
D_FF = 64
EPS = 1e-6


def _layer_norm(v, gamma, beta):
    # Matches the module's custom LayerNorm: mean, unbiased std (ddof=1), /(std + eps).
    d = v.shape[-1]
    mean = jnp.mean(v, axis=-1, keepdims=True)
    var = jnp.sum((v - mean) ** 2, axis=-1, keepdims=True) / (d - 1)
    inv = 1.0 / (jnp.sqrt(var) + EPS)
    return gamma * (v - mean) * inv + beta


def encoder_layer_kernel(x_ref, mask_ref,
                         wqkv_ref, bqkv_ref, woh_ref, bo_ref,
                         w1_ref, b1_ref, w2_ref, b2_ref,
                         g1_ref, be1_ref, g2_ref, be2_ref,
                         out_ref):
    Bb, S, D = x_ref.shape
    H, _, Dh3 = wqkv_ref.shape
    Dh = Dh3 // 3
    M = Bb * S          # flattened rows in this block (b-major, then s)
    G = H * Bb          # collapsed (head, batch) attention batch dim

    x = x_ref[...]                                   # (Bb, S, D)
    mask = mask_ref[...]                             # (Bb, 1, S)

    # Additive mask bias, computed once and laid out on the collapsed (head, batch)
    # dim used by the attention batched matmuls below. Leading-dim broadcast only.
    mbias = jnp.where(mask == 0.0, -1e9, 0.0)                        # (Bb, 1, S)
    mbias_g = jnp.broadcast_to(mbias[None], (H, Bb, 1, S)).reshape(G, 1, S)

    # ---- sublayer 0: pre-norm multi-head self-attention + residual ----
    xn = _layer_norm(x, g1_ref[...], be1_ref[...])   # (Bb, S, D)
    xn2 = xn.reshape(M, D)                           # flatten rows for projections
    xnh = jnp.broadcast_to(xn2[None], (H, M, D))

    # Fused QKV projection for all heads in one batched matmul.
    # wqkv columns per head are [Wq*scale | Wk | Wv]; 1/sqrt(Dh) is pre-folded.
    qkv = jnp.einsum('hmd,hdn->hmn', xnh, wqkv_ref[...],
                     preferred_element_type=jnp.float32) + bqkv_ref[...]  # (H, M, 3Dh)

    # Collapse (H, Bb*S, 3Dh) -> (H*Bb, S, 3Dh): leading-dim split only, no transpose.
    qkv_g = qkv.reshape(G, S, 3 * Dh)
    q = qkv_g[:, :, :Dh]
    k = qkv_g[:, :, Dh:2 * Dh]
    v = qkv_g[:, :, 2 * Dh:]

    scores = jnp.einsum('gqd,gkd->gqk', q, k,
                        preferred_element_type=jnp.float32)              # (G, S, S)
    scores = scores + mbias_g
    scores = scores - jnp.max(scores, axis=-1, keepdims=True)
    e = jnp.exp(scores)
    p = e / jnp.sum(e, axis=-1, keepdims=True)
    ctx = jnp.einsum('gqk,gkd->gqd', p, v,
                     preferred_element_type=jnp.float32)                 # (G, S, Dh)

    # Output projection: per-head matmul with the matching rows of Wo, then a
    # head-sum (== concat(heads) @ Wo) -- no lane slicing / concat needed.
    ctx_h = ctx.reshape(H, M, Dh)
    proj = jnp.einsum('hmd,hdn->hmn', ctx_h, woh_ref[...],
                      preferred_element_type=jnp.float32)                # (H, M, D)
    attn = jnp.sum(proj, axis=0) + bo_ref[...]                           # (M, D)
    x1 = x + attn.reshape(Bb, S, D)                  # dropout p=0 -> identity

    # ---- sublayer 1: pre-norm position-wise feed-forward + residual ----
    xn2b = _layer_norm(x1, g2_ref[...], be2_ref[...]).reshape(M, D)
    h1 = jnp.maximum(
        jnp.dot(xn2b, w1_ref[...], preferred_element_type=jnp.float32) + b1_ref[...], 0.0)
    ff = jnp.dot(h1, w2_ref[...], preferred_element_type=jnp.float32) + b2_ref[...]
    out_ref[...] = x1 + ff.reshape(Bb, S, D)


def _prepare_params(params):
    """Repack torch-style weights into kernel-friendly fused / head-major layouts."""
    (wq, bq, wk, bk, wv, bv, wo, bo, w1, b1, w2, b2, g1, be1, g2, be2) = params
    D = wq.shape[0]
    scale = 1.0 / math.sqrt(D_HEAD)
    wq_s, bq_s = wq * scale, bq * scale              # fold 1/sqrt(Dh) into Q projection

    def heads_cols(w):   # (D, D) -> (H, D, Dh)
        return w.reshape(D, N_HEADS, D_HEAD).transpose(1, 0, 2)

    def heads_bias(b):   # (1, D) -> (H, 1, Dh)
        return b.reshape(1, N_HEADS, D_HEAD).transpose(1, 0, 2)

    wqkv = jnp.concatenate([heads_cols(wq_s), heads_cols(wk), heads_cols(wv)], axis=-1)
    bqkv = jnp.concatenate([heads_bias(bq_s), heads_bias(bk), heads_bias(bv)], axis=-1)
    woh = wo.reshape(N_HEADS, D_HEAD, D)             # (H, Dh, D): rows of Wo per head
    return (wqkv, bqkv, woh, bo, w1, b1, w2, b2, g1, be1, g2, be2)


def _const_index_map(ndim):
    return lambda i, _n=ndim: (0,) * _n


def encoder_layer(x, mask, params, *, block_b=None):
    B, S, D = x.shape
    if block_b is None:
        # Fill the MXU M dim (target ~256 rows) while keeping >= 2 grid steps for
        # v7x's two TensorCores. At the toy B=2 this yields block_b=1, grid=(2,).
        target = max(1, 256 // S)
        block_b = max(1, min(target, B // 2)) if B >= 2 else 1
        while B % block_b:
            block_b -= 1
    assert B % block_b == 0

    kparams = _prepare_params(params)
    grid = (B // block_b,)
    in_specs = [
        pl.BlockSpec((block_b, S, D), lambda i: (i, 0, 0)),
        pl.BlockSpec((block_b, 1, S), lambda i: (i, 0, 0)),
    ] + [pl.BlockSpec(p.shape, _const_index_map(p.ndim)) for p in kparams]

    return pl.pallas_call(
        encoder_layer_kernel,
        out_shape=jax.ShapeDtypeStruct((B, S, D), jnp.float32),
        grid_spec=pltpu.PrefetchScalarGridSpec(
            num_scalar_prefetch=0,
            grid=grid,
            in_specs=in_specs,
            out_specs=pl.BlockSpec((block_b, S, D), lambda i: (i, 0, 0)),
        ),
        compiler_params=pltpu.CompilerParams(dimension_semantics=("parallel",)),
    )(x, mask, *kparams)


def reference(x, mask, params):
    (wq, bq, wk, bk, wv, bv, wo, bo, w1, b1, w2, b2, g1, be1, g2, be2) = params

    def ln(v, g, b):
        d = v.shape[-1]
        mean = v.mean(-1, keepdims=True)
        var = ((v - mean) ** 2).sum(-1, keepdims=True) / (d - 1)
        return g * (v - mean) / (jnp.sqrt(var) + EPS) + b

    B, S, D = x.shape
    xn = ln(x, g1, be1)
    q = (xn @ wq + bq).reshape(B, S, N_HEADS, D_HEAD).transpose(0, 2, 1, 3)
    k = (xn @ wk + bk).reshape(B, S, N_HEADS, D_HEAD).transpose(0, 2, 1, 3)
    v = (xn @ wv + bv).reshape(B, S, N_HEADS, D_HEAD).transpose(0, 2, 1, 3)
    scores = jnp.einsum("bhqd,bhkd->bhqk", q, k) / math.sqrt(D_HEAD)
    scores = jnp.where(mask[:, None, :, :] == 0.0, -1e9, scores)
    p = jax.nn.softmax(scores, axis=-1)
    attn = jnp.einsum("bhqk,bhkd->bhqd", p, v).transpose(0, 2, 1, 3).reshape(B, S, D)
    x1 = x + (attn @ wo + bo)
    xn2 = ln(x1, g2, be2)
    ff = jnp.maximum(xn2 @ w1 + b1, 0.0) @ w2 + b2
    return x1 + ff


if __name__ == "__main__":
    key = jax.random.PRNGKey(0)
    B, S = 2, 8
    keys = jax.random.split(key, 16)

    def w(k, shape, scale=0.05):
        return (scale * jax.random.normal(k, shape)).astype(jnp.float32)

    params = (
        w(keys[0], (D_MODEL, D_MODEL)), w(keys[1], (1, D_MODEL)),   # Wq, bq
        w(keys[2], (D_MODEL, D_MODEL)), w(keys[3], (1, D_MODEL)),   # Wk, bk
        w(keys[4], (D_MODEL, D_MODEL)), w(keys[5], (1, D_MODEL)),   # Wv, bv
        w(keys[6], (D_MODEL, D_MODEL)), w(keys[7], (1, D_MODEL)),   # Wo, bo
        w(keys[8], (D_MODEL, D_FF)),    w(keys[9], (1, D_FF)),      # FFN W1, b1
        w(keys[10], (D_FF, D_MODEL)),   w(keys[11], (1, D_MODEL)),  # FFN W2, b2
        jnp.ones((1, D_MODEL), jnp.float32), jnp.zeros((1, D_MODEL), jnp.float32),  # LN1
        jnp.ones((1, D_MODEL), jnp.float32), jnp.zeros((1, D_MODEL), jnp.float32),  # LN2
    )

    x = jax.random.normal(keys[12], (B, S, D_MODEL), dtype=jnp.float32)
    mask = jnp.ones((B, 1, S), jnp.float32).at[1, 0, 6:].set(0.0)

    out = encoder_layer(x, mask, params)
    jax.block_until_ready(out)

    ref = reference(x, mask, params)
    assert jnp.allclose(out, ref, atol=1e-4, rtol=1e-4), float(jnp.max(jnp.abs(out - ref)))
    print("KERNEL_OK")
</pallas_src>

<mosaic_0001>
module attributes {stable_mosaic.version = 11 : i64} {
  func.func @encoder_layer_kernel(%arg0: i32, %arg1: memref<1x8x32xf32, #tpu.memory_space<vmem>>, %arg2: memref<1x1x8xf32, #tpu.memory_space<vmem>>, %arg3: memref<4x32x24xf32, #tpu.memory_space<vmem>>, %arg4: memref<4x1x24xf32, #tpu.memory_space<vmem>>, %arg5: memref<4x8x32xf32, #tpu.memory_space<vmem>>, %arg6: memref<1x32xf32, #tpu.memory_space<vmem>>, %arg7: memref<32x64xf32, #tpu.memory_space<vmem>>, %arg8: memref<1x64xf32, #tpu.memory_space<vmem>>, %arg9: memref<64x32xf32, #tpu.memory_space<vmem>>, %arg10: memref<1x32xf32, #tpu.memory_space<vmem>>, %arg11: memref<1x32xf32, #tpu.memory_space<vmem>>, %arg12: memref<1x32xf32, #tpu.memory_space<vmem>>, %arg13: memref<1x32xf32, #tpu.memory_space<vmem>>, %arg14: memref<1x32xf32, #tpu.memory_space<vmem>>, %arg15: memref<1x8x32xf32, #tpu.memory_space<vmem>>) attributes {dimension_semantics = [#tpu.dimension_semantics<parallel>], iteration_bounds = array<i64: 2>, scalar_prefetch = 0 : i64, scratch_operands = 0 : i64, tpu.core_type = #tpu.core_type<tc>, window_params = [{transform_indices = @transform_0, window_bounds = array<i64: 1, 8, 32>}, {transform_indices = @transform_1, window_bounds = array<i64: 1, 1, 8>}, {pipeline_mode = #tpu.pipeline_mode<synchronous>, transform_indices = @transform_2, window_bounds = array<i64: 4, 32, 24>}, {pipeline_mode = #tpu.pipeline_mode<synchronous>, transform_indices = @transform_3, window_bounds = array<i64: 4, 1, 24>}, {pipeline_mode = #tpu.pipeline_mode<synchronous>, transform_indices = @transform_4, window_bounds = array<i64: 4, 8, 32>}, {pipeline_mode = #tpu.pipeline_mode<synchronous>, transform_indices = @transform_5, window_bounds = array<i64: 1, 32>}, {pipeline_mode = #tpu.pipeline_mode<synchronous>, transform_indices = @transform_6, window_bounds = array<i64: 32, 64>}, {pipeline_mode = #tpu.pipeline_mode<synchronous>, transform_indices = @transform_7, window_bounds = array<i64: 1, 64>}, {pipeline_mode = #tpu.pipeline_mode<synchronous>, transform_indices = @transform_8, window_bounds = array<i64: 64, 32>}, {pipeline_mode = #tpu.pipeline_mode<synchronous>, transform_indices = @transform_9, window_bounds = array<i64: 1, 32>}, {pipeline_mode = #tpu.pipeline_mode<synchronous>, transform_indices = @transform_10, window_bounds = array<i64: 1, 32>}, {pipeline_mode = #tpu.pipeline_mode<synchronous>, transform_indices = @transform_11, window_bounds = array<i64: 1, 32>}, {pipeline_mode = #tpu.pipeline_mode<synchronous>, transform_indices = @transform_12, window_bounds = array<i64: 1, 32>}, {pipeline_mode = #tpu.pipeline_mode<synchronous>, transform_indices = @transform_13, window_bounds = array<i64: 1, 32>}, {transform_indices = @transform_14, window_bounds = array<i64: 1, 8, 32>}]} {
    %c0 = arith.constant 0 : index
    %c0_0 = arith.constant 0 : index
    %c0_1 = arith.constant 0 : index
    %0 = vector.load %arg1[%c0, %c0_0, %c0_1] : memref<1x8x32xf32, #tpu.memory_space<vmem>>, vector<1x8x32xf32>
    %c0_2 = arith.constant 0 : index
    %c0_3 = arith.constant 0 : index
    %c0_4 = arith.constant 0 : index
    %1 = vector.load %arg2[%c0_2, %c0_3, %c0_4] : memref<1x1x8xf32, #tpu.memory_space<vmem>>, vector<1x1x8xf32>
    %cst = arith.constant 0.000000e+00 : f32
    %2 = vector.broadcast %cst : f32 to vector<1x1x8xf32>
    %3 = arith.cmpf oeq, %1, %2 : vector<1x1x8xf32>
    %cst_5 = arith.constant -1.000000e+09 : f32
    %cst_6 = arith.constant 0.000000e+00 : f32
    %4 = vector.broadcast %cst_5 : f32 to vector<1x1x8xf32>
    %5 = vector.broadcast %cst_6 : f32 to vector<1x1x8xf32>
    %6 = arith.select %3, %4, %5 : vector<1x1x8xi1>, vector<1x1x8xf32>
    %7 = vector.shape_cast %6 : vector<1x1x8xf32> to vector<1x1x1x8xf32>
    %8 = vector.shape_cast %7 : vector<1x1x1x8xf32> to vector<1x1x1x8xf32>
    %9 = vector.broadcast %8 : vector<1x1x1x8xf32> to vector<4x1x1x8xf32>
    %10 = vector.shape_cast %9 : vector<4x1x1x8xf32> to vector<4x1x8xf32>
    %c0_7 = arith.constant 0 : index
    %c0_8 = arith.constant 0 : index
    %11 = vector.load %arg11[%c0_7, %c0_8] : memref<1x32xf32, #tpu.memory_space<vmem>>, vector<1x32xf32>
    %c0_9 = arith.constant 0 : index
    %c0_10 = arith.constant 0 : index
    %12 = vector.load %arg12[%c0_9, %c0_10] : memref<1x32xf32, #tpu.memory_space<vmem>>, vector<1x32xf32>
    %cst_11 = arith.constant dense<0.000000e+00> : vector<1x8xf32>
    %13 = vector.multi_reduction <add>, %0, %cst_11 [2] : vector<1x8x32xf32> to vector<1x8xf32>
    %14 = vector.shape_cast %13 : vector<1x8xf32> to vector<1x8x1xf32>
    %cst_12 = arith.constant 3.200000e+01 : f32
    %15 = vector.broadcast %cst_12 : f32 to vector<1x8x1xf32>
    %16 = arith.divf %14, %15 : vector<1x8x1xf32>
    %17 = vector.broadcast %16 : vector<1x8x1xf32> to vector<1x8x32xf32>
    %18 = arith.subf %0, %17 : vector<1x8x32xf32>
    %19 = arith.mulf %18, %18 : vector<1x8x32xf32>
    %cst_13 = arith.constant dense<0.000000e+00> : vector<1x8xf32>
    %20 = vector.multi_reduction <add>, %19, %cst_13 [2] : vector<1x8x32xf32> to vector<1x8xf32>
    %21 = vector.shape_cast %20 : vector<1x8xf32> to vector<1x8x1xf32>
    %cst_14 = arith.constant 3.100000e+01 : f32
    %22 = vector.broadcast %cst_14 : f32 to vector<1x8x1xf32>
    %23 = arith.divf %21, %22 : vector<1x8x1xf32>
    %24 = math.sqrt %23 : vector<1x8x1xf32>
    %cst_15 = arith.constant 9.99999997E-7 : f32
    %25 = vector.broadcast %cst_15 : f32 to vector<1x8x1xf32>
    %26 = arith.addf %24, %25 : vector<1x8x1xf32>
    %cst_16 = arith.constant 1.000000e+00 : f32
    %27 = vector.broadcast %cst_16 : f32 to vector<1x8x1xf32>
    %28 = arith.divf %27, %26 : vector<1x8x1xf32>
    %29 = vector.broadcast %16 : vector<1x8x1xf32> to vector<1x8x32xf32>
    %30 = arith.subf %0, %29 : vector<1x8x32xf32>
    %31 = vector.shape_cast %11 : vector<1x32xf32> to vector<1x1x32xf32>
    %32 = vector.broadcast %31 : vector<1x1x32xf32> to vector<1x8x32xf32>
    %33 = arith.mulf %32, %30 : vector<1x8x32xf32>
    %34 = vector.broadcast %28 : vector<1x8x1xf32> to vector<1x8x32xf32>
    %35 = arith.mulf %33, %34 : vector<1x8x32xf32>
    %36 = vector.shape_cast %12 : vector<1x32xf32> to vector<1x1x32xf32>
    %37 = vector.broadcast %36 : vector<1x1x32xf32> to vector<1x8x32xf32>
    %38 = arith.addf %35, %37 : vector<1x8x32xf32>
    %39 = vector.shape_cast %38 : vector<1x8x32xf32> to vector<8x32xf32>
    %40 = vector.shape_cast %39 : vector<8x32xf32> to vector<1x8x32xf32>
    %41 = vector.shape_cast %40 : vector<1x8x32xf32> to vector<1x8x32xf32>
    %42 = vector.broadcast %41 : vector<1x8x32xf32> to vector<4x8x32xf32>
    %c0_17 = arith.constant 0 : index
    %c0_18 = arith.constant 0 : index
    %c0_19 = arith.constant 0 : index
    %43 = vector.load %arg3[%c0_17, %c0_18, %c0_19] : memref<4x32x24xf32, #tpu.memory_space<vmem>>, vector<4x32x24xf32>
    "tpu.trace_start"() <{level = 10 : i32, message = "hmd,hdn->hmn"}> : () -> ()
    %cst_20 = arith.constant dense<0.000000e+00> : vector<4x8x24xf32>
    %44 = tpu.matmul %42, %43, %cst_20 {dimension_numbers = #tpu.dot_dimension_numbers<[2], [1], [1], [2], [0, 0, 0, 1, 1, 2], [0], [0]>} : vector<4x8x32xf32>, vector<4x32x24xf32>, vector<4x8x24xf32> -> vector<4x8x24xf32>
    "tpu.trace_stop"() : () -> ()
    %c0_21 = arith.constant 0 : index
    %c0_22 = arith.constant 0 : index
    %c0_23 = arith.constant 0 : index
    %45 = vector.load %arg4[%c0_21, %c0_22, %c0_23] : memref<4x1x24xf32, #tpu.memory_space<vmem>>, vector<4x1x24xf32>
    %46 = vector.broadcast %45 : vector<4x1x24xf32> to vector<4x8x24xf32>
    %47 = arith.addf %44, %46 : vector<4x8x24xf32>
    %48 = vector.extract_strided_slice %47 {offsets = [0, 0, 0], sizes = [4, 8, 8], strides = [1, 1, 1]} : vector<4x8x24xf32> to vector<4x8x8xf32>
    %49 = vector.extract_strided_slice %47 {offsets = [0, 0, 8], sizes = [4, 8, 8], strides = [1, 1, 1]} : vector<4x8x24xf32> to vector<4x8x8xf32>
    %50 = vector.extract_strided_slice %47 {offsets = [0, 0, 16], sizes = [4, 8, 8], strides = [1, 1, 1]} : vector<4x8x24xf32> to vector<4x8x8xf32>
    "tpu.trace_start"() <{level = 10 : i32, message = "gqd,gkd->gqk"}> : () -> ()
    %cst_24 = arith.constant dense<0.000000e+00> : vector<4x8x8xf32>
    %51 = tpu.matmul %48, %49, %cst_24 {dimension_numbers = #tpu.dot_dimension_numbers<[2], [2], [1], [1], [0, 0, 0, 1, 1, 1], [0], [0]>} : vector<4x8x8xf32>, vector<4x8x8xf32>, vector<4x8x8xf32> -> vector<4x8x8xf32>
    "tpu.trace_stop"() : () -> ()
    %52 = vector.broadcast %10 : vector<4x1x8xf32> to vector<4x8x8xf32>
    %53 = arith.addf %51, %52 : vector<4x8x8xf32>
    %cst_25 = arith.constant dense<0xFF800000> : vector<4x8xf32>
    %54 = vector.multi_reduction <maximumf>, %53, %cst_25 [2] : vector<4x8x8xf32> to vector<4x8xf32>
    %55 = vector.shape_cast %54 : vector<4x8xf32> to vector<4x8x1xf32>
    %56 = vector.broadcast %55 : vector<4x8x1xf32> to vector<4x8x8xf32>
    %57 = arith.subf %53, %56 : vector<4x8x8xf32>
    %58 = math.exp %57 : vector<4x8x8xf32>
    %cst_26 = arith.constant dense<0.000000e+00> : vector<4x8xf32>
    %59 = vector.multi_reduction <add>, %58, %cst_26 [2] : vector<4x8x8xf32> to vector<4x8xf32>
    %60 = vector.shape_cast %59 : vector<4x8xf32> to vector<4x8x1xf32>
    %61 = vector.broadcast %60 : vector<4x8x1xf32> to vector<4x8x8xf32>
    %62 = arith.divf %58, %61 : vector<4x8x8xf32>
    "tpu.trace_start"() <{level = 10 : i32, message = "gqk,gkd->gqd"}> : () -> ()
    %cst_27 = arith.constant dense<0.000000e+00> : vector<4x8x8xf32>
    %63 = tpu.matmul %62, %50, %cst_27 {dimension_numbers = #tpu.dot_dimension_numbers<[2], [1], [1], [2], [0, 0, 0, 1, 1, 2], [0], [0]>} : vector<4x8x8xf32>, vector<4x8x8xf32>, vector<4x8x8xf32> -> vector<4x8x8xf32>
    "tpu.trace_stop"() : () -> ()
    %c0_28 = arith.constant 0 : index
    %c0_29 = arith.constant 0 : index
    %c0_30 = arith.constant 0 : index
    %64 = vector.load %arg5[%c0_28, %c0_29, %c0_30] : memref<4x8x32xf32, #tpu.memory_space<vmem>>, vector<4x8x32xf32>
    "tpu.trace_start"() <{level = 10 : i32, message = "hmd,hdn->hmn"}> : () -> ()
    %cst_31 = arith.constant dense<0.000000e+00> : vector<4x8x32xf32>
    %65 = tpu.matmul %63, %64, %cst_31 {dimension_numbers = #tpu.dot_dimension_numbers<[2], [1], [1], [2], [0, 0, 0, 1, 1, 2], [0], [0]>} : vector<4x8x8xf32>, vector<4x8x32xf32>, vector<4x8x32xf32> -> vector<4x8x32xf32>
    "tpu.trace_stop"() : () -> ()
    %cst_32 = arith.constant dense<0.000000e+00> : vector<8x32xf32>
    %66 = vector.multi_reduction <add>, %65, %cst_32 [0] : vector<4x8x32xf32> to vector<8x32xf32>
    %c0_33 = arith.constant 0 : index
    %c0_34 = arith.constant 0 : index
    %67 = vector.load %arg6[%c0_33, %c0_34] : memref<1x32xf32, #tpu.memory_space<vmem>>, vector<1x32xf32>
    %68 = vector.broadcast %67 : vector<1x32xf32> to vector<8x32xf32>
    %69 = arith.addf %66, %68 : vector<8x32xf32>
    %70 = vector.shape_cast %69 : vector<8x32xf32> to vector<1x8x32xf32>
    %71 = arith.addf %0, %70 : vector<1x8x32xf32>
    %c0_35 = arith.constant 0 : index
    %c0_36 = arith.constant 0 : index
    %72 = vector.load %arg13[%c0_35, %c0_36] : memref<1x32xf32, #tpu.memory_space<vmem>>, vector<1x32xf32>
    %c0_37 = arith.constant 0 : index
    %c0_38 = arith.constant 0 : index
    %73 = vector.load %arg14[%c0_37, %c0_38] : memref<1x32xf32, #tpu.memory_space<vmem>>, vector<1x32xf32>
    %cst_39 = arith.constant dense<0.000000e+00> : vector<1x8xf32>
    %74 = vector.multi_reduction <add>, %71, %cst_39 [2] : vector<1x8x32xf32> to vector<1x8xf32>
    %75 = vector.shape_cast %74 : vector<1x8xf32> to vector<1x8x1xf32>
    %cst_40 = arith.constant 3.200000e+01 : f32
    %76 = vector.broadcast %cst_40 : f32 to vector<1x8x1xf32>
    %77 = arith.divf %75, %76 : vector<1x8x1xf32>
    %78 = vector.broadcast %77 : vector<1x8x1xf32> to vector<1x8x32xf32>
    %79 = arith.subf %71, %78 : vector<1x8x32xf32>
    %80 = arith.mulf %79, %79 : vector<1x8x32xf32>
    %cst_41 = arith.constant dense<0.000000e+00> : vector<1x8xf32>
    %81 = vector.multi_reduction <add>, %80, %cst_41 [2] : vector<1x8x32xf32> to vector<1x8xf32>
    %82 = vector.shape_cast %81 : vector<1x8xf32> to vector<1x8x1xf32>
    %cst_42 = arith.constant 3.100000e+01 : f32
    %83 = vector.broadcast %cst_42 : f32 to vector<1x8x1xf32>
    %84 = arith.divf %82, %83 : vector<1x8x1xf32>
    %85 = math.sqrt %84 : vector<1x8x1xf32>
    %cst_43 = arith.constant 9.99999997E-7 : f32
    %86 = vector.broadcast %cst_43 : f32 to vector<1x8x1xf32>
    %87 = arith.addf %85, %86 : vector<1x8x1xf32>
    %cst_44 = arith.constant 1.000000e+00 : f32
    %88 = vector.broadcast %cst_44 : f32 to vector<1x8x1xf32>
    %89 = arith.divf %88, %87 : vector<1x8x1xf32>
    %90 = vector.broadcast %77 : vector<1x8x1xf32> to vector<1x8x32xf32>
    %91 = arith.subf %71, %90 : vector<1x8x32xf32>
    %92 = vector.shape_cast %72 : vector<1x32xf32> to vector<1x1x32xf32>
    %93 = vector.broadcast %92 : vector<1x1x32xf32> to vector<1x8x32xf32>
    %94 = arith.mulf %93, %91 : vector<1x8x32xf32>
    %95 = vector.broadcast %89 : vector<1x8x1xf32> to vector<1x8x32xf32>
    %96 = arith.mulf %94, %95 : vector<1x8x32xf32>
    %97 = vector.shape_cast %73 : vector<1x32xf32> to vector<1x1x32xf32>
    %98 = vector.broadcast %97 : vector<1x1x32xf32> to vector<1x8x32xf32>
    %99 = arith.addf %96, %98 : vector<1x8x32xf32>
    %100 = vector.shape_cast %99 : vector<1x8x32xf32> to vector<8x32xf32>
    %c0_45 = arith.constant 0 : index
    %c0_46 = arith.constant 0 : index
    %101 = vector.load %arg7[%c0_45, %c0_46] : memref<32x64xf32, #tpu.memory_space<vmem>>, vector<32x64xf32>
    %cst_47 = arith.constant dense<0.000000e+00> : vector<8x64xf32>
    %102 = tpu.matmul %100, %101, %cst_47 {dimension_numbers = #tpu.dot_dimension_numbers<[1], [0], [0], [1], [0, 0, 1, 1], [], []>} : vector<8x32xf32>, vector<32x64xf32>, vector<8x64xf32> -> vector<8x64xf32>
    %c0_48 = arith.constant 0 : index
    %c0_49 = arith.constant 0 : index
    %103 = vector.load %arg8[%c0_48, %c0_49] : memref<1x64xf32, #tpu.memory_space<vmem>>, vector<1x64xf32>
    %104 = vector.broadcast %103 : vector<1x64xf32> to vector<8x64xf32>
    %105 = arith.addf %102, %104 : vector<8x64xf32>
    %cst_50 = arith.constant 0.000000e+00 : f32
    %106 = vector.broadcast %cst_50 : f32 to vector<8x64xf32>
    %107 = arith.maximumf %105, %106 : vector<8x64xf32>
    %c0_51 = arith.constant 0 : index
    %c0_52 = arith.constant 0 : index
    %108 = vector.load %arg9[%c0_51, %c0_52] : memref<64x32xf32, #tpu.memory_space<vmem>>, vector<64x32xf32>
    %cst_53 = arith.constant dense<0.000000e+00> : vector<8x32xf32>
    %109 = tpu.matmul %107, %108, %cst_53 {dimension_numbers = #tpu.dot_dimension_numbers<[1], [0], [0], [1], [0, 0, 1, 1], [], []>} : vector<8x64xf32>, vector<64x32xf32>, vector<8x32xf32> -> vector<8x32xf32>
    %c0_54 = arith.constant 0 : index
    %c0_55 = arith.constant 0 : index
    %110 = vector.load %arg10[%c0_54, %c0_55] : memref<1x32xf32, #tpu.memory_space<vmem>>, vector<1x32xf32>
    %111 = vector.broadcast %110 : vector<1x32xf32> to vector<8x32xf32>
    %112 = arith.addf %109, %111 : vector<8x32xf32>
    %113 = vector.shape_cast %112 : vector<8x32xf32> to vector<1x8x32xf32>
    %114 = arith.addf %71, %113 : vector<1x8x32xf32>
    %c0_56 = arith.constant 0 : index
    %c0_57 = arith.constant 0 : index
    %c0_58 = arith.constant 0 : index
    %115 = vector.load %arg15[%c0_56, %c0_57, %c0_58] : memref<1x8x32xf32, #tpu.memory_space<vmem>>, vector<1x8x32xf32>
    tpu.vector_store %arg15[%c0_56, %c0_57, %c0_58], %114 {strides = array<i32>} : memref<1x8x32xf32, #tpu.memory_space<vmem>>, vector<1x8x32xf32>,
    return
  }
  func.func @transform_0(%arg0: i32) -> (i32, i32, i32) {
    %c0_i32 = arith.constant 0 : i32
    %c0_i32_0 = arith.constant 0 : i32
    %c0_i32_1 = arith.constant 0 : i32
    return %arg0, %c0_i32, %c0_i32_0 : i32, i32, i32
  }
  func.func @transform_1(%arg0: i32) -> (i32, i32, i32) {
    %c0_i32 = arith.constant 0 : i32
    %c0_i32_0 = arith.constant 0 : i32
    %c0_i32_1 = arith.constant 0 : i32
    return %arg0, %c0_i32, %c0_i32_0 : i32, i32, i32
  }
  func.func @transform_2(%arg0: i32) -> (i32, i32, i32) {
    %c0_i32 = arith.constant 0 : i32
    %c0_i32_0 = arith.constant 0 : i32
    %c0_i32_1 = arith.constant 0 : i32
    %c0_i32_2 = arith.constant 0 : i32
    return %c0_i32, %c0_i32_0, %c0_i32_1 : i32, i32, i32
  }
  func.func @transform_3(%arg0: i32) -> (i32, i32, i32) {
    %c0_i32 = arith.constant 0 : i32
    %c0_i32_0 = arith.constant 0 : i32
    %c0_i32_1 = arith.constant 0 : i32
    %c0_i32_2 = arith.constant 0 : i32
    return %c0_i32, %c0_i32_0, %c0_i32_1 : i32, i32, i32
  }
  func.func @transform_4(%arg0: i32) -> (i32, i32, i32) {
    %c0_i32 = arith.constant 0 : i32
    %c0_i32_0 = arith.constant 0 : i32
    %c0_i32_1 = arith.constant 0 : i32
    %c0_i32_2 = arith.constant 0 : i32
    return %c0_i32, %c0_i32_0, %c0_i32_1 : i32, i32, i32
  }
  func.func @transform_5(%arg0: i32) -> (i32, i32) {
    %c0_i32 = arith.constant 0 : i32
    %c0_i32_0 = arith.constant 0 : i32
    %c0_i32_1 = arith.constant 0 : i32
    return %c0_i32, %c0_i32_0 : i32, i32
  }
  func.func @transform_6(%arg0: i32) -> (i32, i32) {
    %c0_i32 = arith.constant 0 : i32
    %c0_i32_0 = arith.constant 0 : i32
    %c0_i32_1 = arith.constant 0 : i32
    return %c0_i32, %c0_i32_0 : i32, i32
  }
  func.func @transform_7(%arg0: i32) -> (i32, i32) {
    %c0_i32 = arith.constant 0 : i32
    %c0_i32_0 = arith.constant 0 : i32
    %c0_i32_1 = arith.constant 0 : i32
    return %c0_i32, %c0_i32_0 : i32, i32
  }
  func.func @transform_8(%arg0: i32) -> (i32, i32) {
    %c0_i32 = arith.constant 0 : i32
    %c0_i32_0 = arith.constant 0 : i32
    %c0_i32_1 = arith.constant 0 : i32
    return %c0_i32, %c0_i32_0 : i32, i32
  }
  func.func @transform_9(%arg0: i32) -> (i32, i32) {
    %c0_i32 = arith.constant 0 : i32
    %c0_i32_0 = arith.constant 0 : i32
    %c0_i32_1 = arith.constant 0 : i32
    return %c0_i32, %c0_i32_0 : i32, i32
  }
  func.func @transform_10(%arg0: i32) -> (i32, i32) {
    %c0_i32 = arith.constant 0 : i32
    %c0_i32_0 = arith.constant 0 : i32
    %c0_i32_1 = arith.constant 0 : i32
    return %c0_i32, %c0_i32_0 : i32, i32
  }
  func.func @transform_11(%arg0: i32) -> (i32, i32) {
    %c0_i32 = arith.constant 0 : i32
    %c0_i32_0 = arith.constant 0 : i32
    %c0_i32_1 = arith.constant 0 : i32
    return %c0_i32, %c0_i32_0 : i32, i32
  }
  func.func @transform_12(%arg0: i32) -> (i32, i32) {
    %c0_i32 = arith.constant 0 : i32
    %c0_i32_0 = arith.constant 0 : i32
    %c0_i32_1 = arith.constant 0 : i32
    return %c0_i32, %c0_i32_0 : i32, i32
  }
  func.func @transform_13(%arg0: i32) -> (i32, i32) {
    %c0_i32 = arith.constant 0 : i32
    %c0_i32_0 = arith.constant 0 : i32
    %c0_i32_1 = arith.constant 0 : i32
    return %c0_i32, %c0_i32_0 : i32, i32
  }
  func.func @transform_14(%arg0: i32) -> (i32, i32, i32) {
    %c0_i32 = arith.constant 0 : i32
    %c0_i32_0 = arith.constant 0 : i32
    %c0_i32_1 = arith.constant 0 : i32
    return %arg0, %c0_i32, %c0_i32_0 : i32, i32, i32
  }
}

</mosaic_0001>

<bundles_post_ra>
// kernel: tpu_custom_call.1
= control target key start
LH: loop header
LB: loop body
LE: loop exit
PB: predicated region body
PF: predicated region fallthrough
CT: control target
= control target key end

     0   :  { %s2974_s0 = inlined_call_operand.vmem [shape: f32[2,8,32], index: 0, kind: input, shape index: {}]   ;;  %s2975_s1 = inlined_call_operand.vmem [shape: f32[2,1,8], index: 1, kind: input, shape index: {}]   ;;  %s2976_s2 = inlined_call_operand.vmem [shape: f32[4,32,24], index: 2, kind: input, shape index: {}]   ;;  %s2977_s3 = inlined_call_operand.vmem [shape: f32[4,1,24], index: 3, kind: input, shape index: {}]   ;;  %s2978_s4 = inlined_call_operand.vmem [shape: f32[4,8,32], index: 4, kind: input, shape index: {}]   ;;  %s2979_s5 = inlined_call_operand.vmem [shape: f32[1,32], index: 5, kind: input, shape index: {}]   ;;  %s2980_s6 = inlined_call_operand.vmem [shape: f32[32,64], index: 6, kind: input, shape index: {}]   ;;  %s2981_s7 = inlined_call_operand.vmem [shape: f32[1,64], index: 7, kind: input, shape index: {}]   ;;  %s2982_s8 = inlined_call_operand.vmem [shape: f32[64,32], index: 8, kind: input, shape index: {}]   ;;  %s2983_s9 = inlined_call_operand.vmem [shape: f32[1,32], index: 9, kind: input, shape index: {}]   ;;  %s2984_s10 = inlined_call_operand.vmem [shape: f32[1,32], index: 10, kind: input, shape index: {}]   ;;  %s2985_s11 = inlined_call_operand.vmem [shape: f32[1,32], index: 11, kind: input, shape index: {}]   ;;  %s2986_s12 = inlined_call_operand.vmem [shape: f32[1,32], index: 12, kind: input, shape index: {}]   ;;  %s2987_s13 = inlined_call_operand.vmem [shape: f32[1,32], index: 13, kind: input, shape index: {}]   ;;  %s2988_s14 = inlined_call_operand.hbm [shape: f32[2,8,32], index: 14, kind: output, shape index: {}]  }
   0x1   :  { %2992 = sst [smem:[#allocation8_spill]] %s2974_s0 }
   0x2   :  { %19 = vsyncpa [#allocation3], 0 }
   0x3   :  { %21 = vsyncpa [#allocation3 + $0x1], 0  ;;  %s2608_s29 = smov 0   ;;  %s2610_s30 = smov 0  }
   0x4   :  { %s2612_s15 = smov 0   ;;  %s2614_s16 = smov 0  }
   0x5 LB: > { %2993 = sst [smem:[#allocation5_spill]] %s2521_s15  ;;  %s2629_s17 = sadd.s32 4294967295, %s2525_s16   ;;  %s2525_s16 = sphi %s2614_s16, %s2999_s16   ;;  %s2521_s15 = sphi %s2612_s15, %s3001_s15   ;;  %s2517_s30 = sphi %s2610_s30, %s3003_s30   ;;  %s2513_s29 = sphi %s2608_s29, %s3002_s29  }
   0x6   : > { %s2118_s18 = sadd.s32 4294967294, %s2525_s16   ;;  %s2633_s19 = sadd.s32 1, %s2525_s16  }
   0x7   : > { %2994 = sst [smem:[#allocation6_spill]] %s2633_s19  ;;  %s338_s20 = sadd.s32 1, %s2521_s15 }
   0x8   : > { %s335_s21 = ssub.s32 %s2525_s16, %s2633_s19  ;;  %p348_p0 = scmp.ne.s32.totalorder %s2521_s15, %s2517_s30 }
   0x9   : > { %p336_p1 = scmp.eq.s32.totalorder %s335_s21, 0  ;;  %p349_p2 = scmp.eq.s32.totalorder %s2629_s17, 1 }
   0xa   : > { %p354_p3 = scmp.ne.s32.totalorder %s2517_s30, %s2513_s29  ;;  %p355_p4 = scmp.eq.s32.totalorder %s2118_s18, 1 }
   0xb   : > { %s2644_s22 = scalar_select %p336_p1, %s2521_s15, %s338_s20  }
   0xc   : > { %p2646_p5 = por %p349_p2, %p348_p0  ;;  %p2650_p6 = por %p355_p4, %p354_p3 }
   0xd   : > { %2995 = sst [smem:[#allocation7_spill]] %s2644_s22  ;;  %p2121_p7 = scmp.ge.s32.totalorder %s2525_s16, 1 }
   0xe   : > { %p422_p8 = scmp.lt.s32.totalorder %s2525_s16, 3 }
  0x10   : > { %p423_p9 = pnand %p2121_p7, %p422_p8 }
  0x11   : > { %p470_p10 = scmp.lt.s32.totalorder (!%p423_p9), %s2629_s17, 1  ;;  %vm483_vm0 = vcmask (!%p423_p9), 261120   ;;  %s2998_s0 = sld [smem:[#allocation8_spill]] (!%p423_p9)  ;;  %v521_v7 = vld [vmem:[%s2976_s2] sm:$0xff] (!%p423_p9)  ;;  %v522_v8 = vld [vmem:[%s2976_s2 + $0x8] sm:$0xff] (!%p423_p9)  ;;  %v2527_v10 = vmov (!%p423_p9), 0.0|0.0  }
  0x12   : > { %426 = sbr.rel (%p423_p9) target bundleno = 2431 (0x97f), region = 76  ;;  %v525_v9 = vld [vmem:[%s2976_s2 + $0x20] sm:$0xff] (!%p423_p9)  ;;  %2353 = vmatprep.subr.bf16.mxu0 (!%p423_p9), %v2527_v10  ;;  %2359 = vmatprep.subr.bf16.mxu1 (!%p423_p9), %v2527_v10  ;;  %v2354_v11 = vpack.c.bf16 (!%p423_p9), %v522_v8, %v521_v7  ;;  %v526_v12 = vld [vmem:[%s2976_s2 + $0x28] sm:$0xff] (!%p423_p9)  ;;  %v523_v13 = vld [vmem:[%s2976_s2 + $0x10] sm:$0xff] (!%p423_p9)  ;;  %vm2528_vm1 = vmmov (!%p423_p9), 0   ;;  %v2529_v18 = vmov (!%p423_p9), 0.0  }
  0x13   : > { %v524_v14 = vld [vmem:[%s2976_s2 + $0x18] sm:$0xff] (!%p423_p9)  ;;  %v2360_v15 = vpack.c.bf16 (!%p423_p9), %v526_v12, %v525_v9  ;;  %v527_v16 = vld [vmem:[%s2976_s2 + $0x30] sm:$0xff] (!%p423_p9)  ;;  %2227 = vmatprep.mubr.msk.f32.mxu0 (!%p423_p9), %vm2528_vm1, %v2529_v18  ;;  %2238 = vmatprep.mubr.msk.f32.mxu1 (!%p423_p9), %vm2528_vm1, %v2529_v18  ;;  %v2124_v29 = vld [vmem:[%s2984_s10] ss:$0 sm:$0xff] (!%p423_p9)  ;;  %s2530_s20 = smov (!%p423_p9), 120   ;;  %vm857_vm4 = vcmask (!%p423_p9), 64512  }
  0x14   : > { %v528_v17 = vld [vmem:[%s2976_s2 + $0x38] sm:$0xff] (!%p423_p9)  ;;  %2355 = vmatpush3.bf16.msra.mxu0 (!%p423_p9), %v2354_v11  ;;  %v2357_v19 = vpack.c.bf16 (!%p423_p9), %v524_v14, %v523_v13  ;;  %v529_v30 = vld [vmem:[%s2976_s2 + $0x40] sm:$0xff] (!%p423_p9)  ;;  %v530_v32 = vld [vmem:[%s2976_s2 + $0x48] sm:$0xff] (!%p423_p9)  ;;  %vm1960_vm8 = vcmask (!%p423_p9), 523264   ;;  %s2158_s19 = sshll.u32 (!%p423_p9), %s2629_s17, 7 }
  0x15   : > { %2361 = vmatpush3.bf16.msra.mxu1 (!%p423_p9), %v2360_v15  ;;  %2356 = vmatprep.subr.bf16.mxu0 (!%p423_p9), %v2527_v10  ;;  %v2363_v20 = vpack.c.bf16 (!%p423_p9), %v528_v17, %v527_v16  ;;  %v533_v33 = vld [vmem:[%s2976_s2 + $0x60] sm:$0xff] (!%p423_p9)  ;;  %v534_v34 = vld [vmem:[%s2976_s2 + $0x68] sm:$0xff] (!%p423_p9)  ;;  %v2366_v38 = vpack.c.bf16 (!%p423_p9), %v530_v32, %v529_v30  ;;  %v531_v40 = vld [vmem:[%s2976_s2 + $0x50] sm:$0xff] (!%p423_p9) }
  0x16   : > { %2362 = vmatprep.subr.bf16.mxu1 (!%p423_p9), %v2527_v10  ;;  %v2125_v36 = vld [vmem:[%s2985_s11] ss:$0 sm:$0xff] (!%p423_p9)  ;;  %v2372_v39 = vpack.c.bf16 (!%p423_p9), %v534_v34, %v533_v33  ;;  %v532_v42 = vld [vmem:[%s2976_s2 + $0x58] sm:$0xff] (!%p423_p9)  ;;  %v535_v43 = vld [vmem:[%s2976_s2 + $0x70] sm:$0xff] (!%p423_p9) }
  0x17   : > { %v536_v44 = vld [vmem:[%s2976_s2 + $0x78] sm:$0xff] (!%p423_p9)  ;;  %v2369_v45 = vpack.c.bf16 (!%p423_p9), %v532_v42, %v531_v40  ;;  %v2126_v47 = vld [vmem:[%s2977_s3] ss:$0 sm:$0xff] (!%p423_p9)  ;;  %v2127_v53 = vld [vmem:[%s2977_s3 + $0x1] ss:$0 sm:$0xff] (!%p423_p9) }
  0x18   : > { %2358 = vmatpush3.bf16.msra.mxu0 (!%p423_p9), %v2357_v19  ;;  %v2375_v46 = vpack.c.bf16 (!%p423_p9), %v536_v44, %v535_v43  ;;  %v2129_v55 = vld [vmem:[%s2977_s3 + $0x3] ss:$0 sm:$0xff] (!%p423_p9)  ;;  %v2128_v56 = vld [vmem:[%s2977_s3 + $0x2] ss:$0 sm:$0xff] (!%p423_p9) }
  0x19   : > { %s2658_s25 = scalar_select %p470_p10, %s2629_s17, 1  ;;  %2364 = vmatpush3.bf16.msra.mxu1 %v2363_v20  ;;  %2365 = vmatprep.subr.bf16.mxu0 %v2527_v10 }
  0x1a   : > { %2371 = vmatprep.subr.bf16.mxu1 %v2527_v10 }
  0x1b   : > { %s2123_s26 = sshll.u32 %s2658_s25, 3  ;;  %s476_s15 = scalar_lea.vmem %s2975_s1, %s2658_s25 }
  0x1c   : > { %s473_s18 = scalar_lea.vmem %s2998_s0, %s2123_s26  ;;  %s2531_s25 = smov 112  }
  0x1d   : > { %v2664_v0 = vld [vmem:[%s473_s18] sm:$0xff]  ;;  %s467_s18 = sand.u32 1, %s2517_s30   ;;  %s2931_s26 = scalar_lea.hbm %s2988_s14, %s2158_s19 }
  0x1e   : > { %v484_v1 = vsel %vm483_vm0, %v2664_v0, 0.0  ;;  %s2122_s0 = sshll.u32 %s467_s18, 3  ;;  %s2037_s28 = scalar_lea.sflag [#allocation3], %s467_s18 }
  0x1f   : > { %485 = vadd.xlane.f32.xlu0 %v484_v1  ;;  %s469_s22 = scalar_lea.vmem [#allocation2], %s2122_s0  ;;  %s2532_s0 = smov [#allocation2]  }
  0xac   : > { %v486_v2 = vpop.xlane.xlu0 %485 }
  0xad   : > { %v488_v3 = vmul.f32 0.03125, %v486_v2 }
  0xaf   : > { %v489_v4 = vsub.f32 %v2664_v0, %v488_v3 }
  0xb1   : > { %v490_v5 = vmul.f32 %v489_v4, %v489_v4  ;;  %v512_v31 = vmul.f32 %v2124_v29, %v489_v4  ;;  %v849_v4 = vlaneseq }
  0xb3   : > { %v491_v6 = vsel %vm483_vm0, %v490_v5, 0.0  ;;  %v478_v5 = vld [vmem:[%s476_s15] sm:$0x1]  ;;  %s2467_s15 = sshll.u32 %s2532_s0, 4  ;;  %s2468_s15 = int_to_ptr.vmem [resolvable:$false] %s2467_s15 }
  0xb4   : > { %492 = vadd.xlane.f32.xlu0 %v491_v6  ;;  %v850_v6 = vshrl.u32 %v849_v4, 7  ;;  %vm479_vm5 = vcmp.eq.f32.partialorder %v478_v5, 0.0 }
  0xb5   : > { %v480_v8 = vsel %vm479_vm5, -1e+09, %v2529_v18 }
  0xb6   : > { %v851_v7 = vsub.s32 0, %v850_v6  ;;  %v1514_v6 = vld [vmem:[%s2978_s4 + $0x18] sm:$0xff] }
  0xb8   : > { %v852_v9 = vrot.slane %v480_v8, %v851_v7 }
 0x141   : > { %v493_v21 = vpop.xlane.xlu0 %492 }
 0x142   : > { %v495_v22 = vmul.f32 0.032258064, %v493_v21 }
 0x144   : > { %2439 = vrsqrt.f32 %v495_v22  ;;  %vm498_vm2 = vcmp.eq.f32.partialorder %v495_v22, inf  ;;  %v501_v25 = vand.u32 2147483648, %v495_v22  ;;  %vm500_vm3 = vcmp.eq.f32.partialorder %v495_v22, 0.0 }
 0x14e   : > { %v2440_v23 = vpop.eup %2439 }
 0x14f   : > { %v497_v24 = vmul.f32 %v2440_v23, %v495_v22 }
 0x151   : > { %v499_v26 = vsel %vm498_vm2, %v495_v22, %v497_v24 }
 0x152   : > { %v502_v27 = vsel %vm500_vm3, %v501_v25, %v499_v26 }
 0x153   : > { %v503_v28 = vadd.f32 1e-06, %v502_v27 }
 0x155   : > { %2441 = vrcp.f32 %v503_v28 }
 0x15f   : > { %v2442_v35 = vpop.eup %2441 }
 0x160   : > { %v513_v37 = vmul.f32 %v2442_v35, %v512_v31 }
 0x162   : > { %v520_v41 = vadd.f32 %v2125_v36, %v513_v37 }
 0x164   : > { %2228 = vmatmul.mubr.msk.f32.vlgmr.msra.gmra.mrb[0].mxu0 %vm483_vm0, %v520_v41  ;;  %2239 = vmatmul.mubr.msk.f32.vlgmr.msra.gmra.mrb[0].mxu1 %vm483_vm0, %v520_v41 }
 0x165   : > { %2367 = vmatpush3.bf16.msra.mxu0 %v2366_v38  ;;  %2373 = vmatpush3.bf16.msra.mxu1 %v2372_v39 }
 0x166   : > { %2368 = vmatprep.subr.bf16.mxu0 %v2527_v10  ;;  %2374 = vmatprep.subr.bf16.mxu1 %v2527_v10 }
 0x167   : > { %2249 = vmatprep.mubr.msk.f32.mxu0 %vm2528_vm1, %v2529_v18  ;;  %2260 = vmatprep.mubr.msk.f32.mxu1 %vm2528_vm1, %v2529_v18 }
 0x169   : > { %2370 = vmatpush3.bf16.msra.mxu0 %v2369_v45  ;;  %2376 = vmatpush3.bf16.msra.mxu1 %v2375_v46 }
 0x16a   : > { %2263 = vmatprep.subr.mxu0 %v2529_v18  ;;  %2278 = vmatprep.subr.mxu1 %v2529_v18 }
 0x16c   : > { %2250 = vmatmul.mubr.msk.f32.vlgmr.msra.gmra.mrb[2].mxu0 %vm483_vm0, %v520_v41  ;;  %2261 = vmatmul.mubr.msk.f32.vlgmr.msra.gmra.mrb[2].mxu1 %vm483_vm0, %v520_v41 }
 0x16d   : > { %2265 = vmatprep.mubr.msk.f32.mxu0 %vm2528_vm1, %v2529_v18  ;;  %2280 = vmatprep.mubr.msk.f32.mxu1 %vm2528_vm1, %v2529_v18 }
 0x237   : > { %v634_v48 = vpop.f32.mrb[0].mxu0  ;;  %v704_v49 = vpop.f32.mrb[0].mxu1 }
 0x238   : > { %v2753_v50 = vadd.f32 %v2126_v47, %v634_v48  ;;  %v2229_v51 = vpop.f32.mrb[1].mxu0  ;;  %v2240_v52 = vpop.f32.mrb[1].mxu1  ;;  %v705_v54 = vadd.f32 %v2127_v53, %v704_v49 }
 0x23a   : > { %855 = vrot.lane.b32.xlu1 %v2753_v50, %s2530_s20 }
 0x23e   : > { %933 = vrot.lane.b32.xlu1 %v705_v54, %s2530_s20 }
 0x23f   : > { %v844_v57 = vpop.f32.mrb[2].mxu1  ;;  %v774_v58 = vpop.f32.mrb[2].mxu0 }
 0x240   : > { %v2765_v59 = vadd.f32 %v2129_v55, %v844_v57  ;;  %v2767_v60 = vadd.f32 %v2128_v56, %v774_v58  ;;  %v2251_v61 = vpop.f32.mrb[3].mxu0  ;;  %v2262_v62 = vpop.f32.mrb[3].mxu1 }
 0x242   : > { %1010 = vrot.lane.b32.xlu0 %v2767_v60, %s2530_s20  ;;  %1087 = vrot.lane.b32.xlu1 %v2765_v59, %s2530_s20  ;;  %s2050_s20 = sshll.u32 %s469_s22, 4  ;;  %s2933_s20 = int_to_ptr.vmem [resolvable:$true] %s2050_s20 }
 0x243   : > { %s2463_s17 = scalar_lea.vmem %s2933_s20, 128  ;;  %p2470_p0 = scmp.lt.s32.totalorder %s2933_s20, %s2468_s15 }
 0x244   : > { %p2464_p11 = scmp.ne.s32.totalorder %s2933_s20, %s2463_s17 }
 0x246   : > { %p2465_p12 = pnand %p2464_p11, %p2646_p5 }
 0x248   : > { %p2466_p13 = pneg %p2465_p12 }
 0x2ac   : > { %v856_v63 = vpop.permute.xlu1 %855 }
 0x2ad   : > { %2264 = vmatpush3.xpose.msk.msra.mxu0 %vm857_vm4, %v856_v63 }
 0x2ae   : > { %2268 = vmatprep.subr.mxu0 %v2529_v18 }
 0x2b0   : > { %2266 = vmatmul.mubr.msk.f32.vlgmr.msra.gmra.mrb[4].mxu0 %vm857_vm4, %v2753_v50  ;;  %v934_v1 = vpop.permute.xlu1 %933 }
 0x2b1   : > { %2269 = vmatpush3.xpose.msk.msra.mxu0 %vm857_vm4, %v934_v1  ;;  %2270 = vmatprep.mubr.msk.f32.mxu0 %vm2528_vm1, %v2529_v18  ;;  %v1511_v1 = vld [vmem:[%s2978_s4] sm:$0xff] }
 0x2b2   : > { %2273 = vmatprep.subr.mxu0 %v2529_v18 }
 0x2b4   : > { %v1011_v2 = vpop.permute.xlu0 %1010  ;;  %2271 = vmatmul.mubr.msk.f32.vlgmr.msra.gmra.mrb[6].mxu0 %vm857_vm4, %v705_v54  ;;  %v1088_v3 = vpop.permute.xlu1 %1087 }
 0x2b5   : > { %2274 = vmatpush3.xpose.msk.msra.mxu0 %vm857_vm4, %v1011_v2  ;;  %2279 = vmatpush3.xpose.msk.msra.mxu1 %vm857_vm4, %v1088_v3  ;;  %v1512_v2 = vld [vmem:[%s2978_s4 + $0x8] sm:$0xff]  ;;  %v1513_v3 = vld [vmem:[%s2978_s4 + $0x10] sm:$0xff] }
 0x2b6   : > { %2275 = vmatprep.mubr.msk.f32.mxu0 %vm2528_vm1, %v2529_v18  ;;  %2283 = vmatprep.subr.mxu0 %v2529_v18 }
 0x2b7   : > { %2288 = vmatprep.subr.mxu1 %v2529_v18 }
 0x2b8   : > { %2276 = vmatmul.mubr.msk.f32.vlgmr.msra.gmra.mrb[8].mxu0 %vm857_vm4, %v2767_v60  ;;  %2281 = vmatmul.mubr.msk.f32.vlgmr.msra.gmra.mrb[4].mxu1 %vm857_vm4, %v2765_v59 }
 0x2b9   : > { %2285 = vmatprep.mubr.msk.f32.mxu0 %vm2528_vm1, %v2529_v18  ;;  %2290 = vmatprep.mubr.msk.f32.mxu1 %vm2528_vm1, %v2529_v18 }
 0x383   : > { %v928_v11 = vpop.f32.mrb[4].mxu0 }
 0x384   : > { %v929_v12 = vadd.f32 %v928_v11, %v852_v9  ;;  %v2267_v13 = vpop.f32.mrb[5].mxu0 }
 0x386   : > { %v1163_v14 = vsel %vm857_vm4, %v929_v12, -inf }
 0x387   : > { %1164 = vmax.xlane.f32.xlu1 %v1163_v14  ;;  %v1005_v15 = vpop.f32.mrb[6].mxu0 }
 0x388   : > { %v1006_v16 = vadd.f32 %v1005_v15, %v852_v9  ;;  %v2272_v17 = vpop.f32.mrb[7].mxu0 }
 0x38a   : > { %v1166_v19 = vsel %vm857_vm4, %v1006_v16, -inf }
 0x38b   : > { %v1159_v20 = vpop.f32.mrb[4].mxu1  ;;  %1167 = vmax.xlane.f32.xlu0 %v1166_v19  ;;  %v1082_v21 = vpop.f32.mrb[8].mxu0 }
 0x38c   : > { %v1160_v22 = vadd.f32 %v1159_v20, %v852_v9  ;;  %v1083_v23 = vadd.f32 %v1082_v21, %v852_v9  ;;  %v2277_v24 = vpop.f32.mrb[9].mxu0  ;;  %v2282_v25 = vpop.f32.mrb[5].mxu1 }
 0x38e   : > { %v1169_v26 = vsel %vm857_vm4, %v1083_v23, -inf  ;;  %v1172_v27 = vsel %vm857_vm4, %v1160_v22, -inf }
 0x38f   : > { %1170 = vmax.xlane.f32.xlu1 %v1169_v26 }
 0x393   : > { %1173 = vmax.xlane.f32.xlu1 %v1172_v27 }
 0x3a1   : > { %1207 = vrot.lane.b32.xlu0 %v2753_v50, %s2531_s25 }
 0x3a4   : > { %1283 = vrot.lane.b32.xlu1 %v705_v54, %s2531_s25 }
 0x414   : > { %v1165_v28 = vpop.xlane.xlu1 %1164 }
 0x415   : > { %v1175_v29 = vsub.f32 %v929_v12, %v1165_v28 }
 0x417   : > { %v1179_v30 = vmul.f32 1.442695, %v1175_v29 }
 0x418   : > { %v1168_v31 = vpop.xlane.xlu0 %1167 }
 0x419   : > { %2443 = vpow2.f32 %v1179_v30  ;;  %v1176_v32 = vsub.f32 %v1006_v16, %v1168_v31 }
 0x41b   : > { %v1181_v33 = vmul.f32 1.442695, %v1176_v32 }
 0x41c   : > { %v1208_v34 = vpop.permute.xlu0 %1207  ;;  %v1171_v35 = vpop.xlane.xlu1 %1170 }
 0x41d   : > { %2445 = vpow2.f32 %v1181_v33  ;;  %v1177_v36 = vsub.f32 %v1083_v23, %v1171_v35  ;;  %2284 = vmatpush3.msra.mxu0 %v1208_v34 }
 0x41e   : > { %2293 = vmatprep.subr.mxu0 %v2529_v18 }
 0x41f   : > { %v1183_v37 = vmul.f32 1.442695, %v1177_v36 }
 0x420   : > { %v1174_v38 = vpop.xlane.xlu1 %1173 }
 0x421   : > { %2447 = vpow2.f32 %v1183_v37  ;;  %v1178_v39 = vsub.f32 %v1160_v22, %v1174_v38  ;;  %v1860_v38 = vld [vmem:[%s2980_s6] sm:$0xff] }
 0x423   : > { %v2444_v40 = vpop.eup %2443  ;;  %v1185_v41 = vmul.f32 1.442695, %v1178_v39  ;;  %v1862_v39 = vld [vmem:[%s2980_s6 + $0x10] sm:$0xff] }
 0x424   : > { %v1284_v42 = vpop.permute.xlu1 %1283  ;;  %v1187_v43 = vsel %vm857_vm4, %v2444_v40, 0.0 }
 0x425   : > { %2449 = vpow2.f32 %v1185_v41  ;;  %1188 = vadd.xlane.f32.xlu1 %v1187_v43  ;;  %2289 = vmatpush3.msra.mxu1 %v1284_v42  ;;  %v1863_v41 = vld [vmem:[%s2980_s6 + $0x18] sm:$0xff]  ;;  %v1945_v43 = vld [vmem:[%s2982_s8] sm:$0xff] }
 0x426   : > { %2298 = vmatprep.subr.mxu1 %v2529_v18  ;;  %v2381_v42 = vpack.c.bf16 %v1863_v41, %v1862_v39 }
 0x427   : > { %v2446_v44 = vpop.eup %2445 }
 0x428   : > { %v1190_v45 = vsel %vm857_vm4, %v2446_v44, 0.0 }
 0x429   : > { %1191 = vadd.xlane.f32.xlu1 %v1190_v45  ;;  %v1947_v45 = vld [vmem:[%s2982_s8 + $0x10] sm:$0xff] }
 0x42b   : > { %v2448_v46 = vpop.eup %2447 }
 0x42c   : > { %v1193_v47 = vsel %vm857_vm4, %v2448_v46, 0.0 }
 0x42d   : > { %1194 = vadd.xlane.f32.xlu0 %v1193_v47  ;;  %v1948_v47 = vld [vmem:[%s2982_s8 + $0x18] sm:$0xff] }
 0x42f   : > { %v2450_v48 = vpop.eup %2449 }
 0x430   : > { %v1196_v49 = vsel %vm857_vm4, %v2450_v48, 0.0 }
 0x431   : > { %1197 = vadd.xlane.f32.xlu1 %v1196_v49  ;;  %v1949_v49 = vld [vmem:[%s2982_s8 + $0x20] sm:$0xff] }
 0x442   : > { %1359 = vrot.lane.b32.xlu1 %v2767_v60, %s2531_s25 }
 0x443   : > { %1435 = vrot.lane.b32.xlu0 %v2765_v59, %s2531_s25  ;;  %s2469_s25 = scalar_lea.vmem %s2468_s15, 256 }
 0x444   : > { %p2471_p1 = scmp.lt.s32.totalorder %s2469_s25, %s2463_s17 }
 0x446   : > { %p2472_p2 = por %p2471_p1, %p2470_p0 }
 0x448   : > { %p2473_p3 = pnand %p2472_p2, %p2466_p13 }
 0x4b2   : > { %v1189_v50 = vpop.xlane.xlu1 %1188 }
 0x4b3   : > { %2451 = vrcp.f32 %v1189_v50  ;;  %v1950_v50 = vld [vmem:[%s2982_s8 + $0x28] sm:$0xff] }
 0x4b6   : > { %v1192_v51 = vpop.xlane.xlu1 %1191 }
 0x4b7   : > { %2453 = vrcp.f32 %v1192_v51  ;;  %v2390_v51 = vpack.c.bf16 %v1950_v50, %v1949_v49 }
 0x4ba   : > { %v1195_v52 = vpop.xlane.xlu0 %1194 }
 0x4bb   : > { %2455 = vrcp.f32 %v1195_v52 }
 0x4bd   : > { %v2452_v53 = vpop.eup %2451 }
 0x4be   : > { %v1200_v54 = vmul.f32 %v2452_v53, %v2444_v40  ;;  %v1198_v55 = vpop.xlane.xlu1 %1197  ;;  %v1436_v59 = vpop.permute.xlu0 %1435 }
 0x4bf   : > { %2457 = vrcp.f32 %v1198_v55 }
 0x4c0   : > { %2286 = vmatmul.mubr.msk.f32.vlgmr.msra.gmra.mrb[10].mxu0 %vm857_vm4, %v1200_v54 }
 0x4c1   : > { %v2454_v56 = vpop.eup %2453  ;;  %2295 = vmatprep.mubr.msk.f32.mxu0 %vm2528_vm1, %v2529_v18 }
 0x4c2   : > { %v1202_v57 = vmul.f32 %v2454_v56, %v2446_v44  ;;  %v1360_v58 = vpop.permute.xlu1 %1359  ;;  %v1946_v44 = vld [vmem:[%s2982_s8 + $0x8] sm:$0xff] }
 0x4c3   : > { %2294 = vmatpush3.msra.mxu0 %v1360_v58 }
 0x4c4   : > { %2291 = vmatmul.mubr.msk.f32.vlgmr.msra.gmra.mrb[6].mxu1 %vm857_vm4, %v1202_v57  ;;  %2303 = vmatprep.subr.mxu0 %v2529_v18 }
 0x4c5   : > { %v2456_v60 = vpop.eup %2455  ;;  %2299 = vmatpush3.msra.mxu1 %v1436_v59  ;;  %2300 = vmatprep.mubr.msk.f32.mxu1 %vm2528_vm1, %v2529_v18 }
 0x4c6   : > { %v1204_v61 = vmul.f32 %v2456_v60, %v2448_v46  ;;  %2308 = vmatprep.subr.mxu1 %v2529_v18  ;;  %v2384_v46 = vpack.c.bf16 %v1946_v44, %v1945_v43  ;;  %v2151_v60 = vld [vmem:[%s2986_s12] ss:$0 sm:$0xff] }
 0x4c8   : > { %2296 = vmatmul.mubr.msk.f32.vlgmr.msra.gmra.mrb[12].mxu0 %vm857_vm4, %v1204_v61 }
 0x4c9   : > { %v2458_v62 = vpop.eup %2457  ;;  %2305 = vmatprep.mubr.msk.f32.mxu0 %vm2528_vm1, %v2529_v18  ;;  %2304 = vmatpush3.msra.mxu0 %v1511_v1 }
 0x4ca   : > { %v1206_v63 = vmul.f32 %v2458_v62, %v2450_v48  ;;  %2313 = vmatprep.subr.mxu0 %v2529_v18  ;;  %v2387_v48 = vpack.c.bf16 %v1948_v47, %v1947_v45 }
 0x4cc   : > { %2301 = vmatmul.mubr.msk.f32.vlgmr.msra.gmra.mrb[8].mxu1 %vm857_vm4, %v1206_v63 }
 0x4cd   : > { %2310 = vmatprep.mubr.msk.f32.mxu1 %vm2528_vm1, %v2529_v18  ;;  %2309 = vmatpush3.msra.mxu1 %v1512_v2  ;;  %v1951_v2 = vld [vmem:[%s2982_s8 + $0x30] sm:$0xff] }
 0x4ce   : > { %2318 = vmatprep.subr.mxu1 %v2529_v18 }
 0x593   : > { %v1279_v4 = vpop.f32.mrb[10].mxu0 }
 0x594   : > { %v2287_v5 = vpop.f32.mrb[11].mxu0  ;;  %2306 = vmatmul.mubr.msk.f32.vlgmr.msra.gmra.mrb[14].mxu0 %vm857_vm4, %v1279_v4 }
 0x595   : > { %2314 = vmatpush3.msra.mxu0 %v1513_v3  ;;  %2315 = vmatprep.mubr.msk.f32.mxu0 %vm2528_vm1, %v2529_v18  ;;  %v1952_v3 = vld [vmem:[%s2982_s8 + $0x38] sm:$0xff]  ;;  %v2153_v5 = vld [vmem:[%s2981_s7] ss:$0 sm:$0xff] }
 0x596   : > { %2377 = vmatprep.subr.bf16.mxu0 %v2527_v10  ;;  %v2393_v4 = vpack.c.bf16 %v1952_v3, %v1951_v2 }
 0x597   : > { %v1355_v7 = vpop.f32.mrb[6].mxu1 }
 0x598   : > { %v2292_v8 = vpop.f32.mrb[7].mxu1  ;;  %2311 = vmatmul.mubr.msk.f32.vlgmr.msra.gmra.mrb[10].mxu1 %vm857_vm4, %v1355_v7 }
 0x599   : > { %2319 = vmatpush3.msra.mxu1 %v1514_v6  ;;  %2320 = vmatprep.mubr.msk.f32.mxu1 %vm2528_vm1, %v2529_v18 }
 0x59a   : > { %2383 = vmatprep.subr.bf16.mxu1 %v2527_v10 }
 0x59b   : > { %v1431_v9 = vpop.f32.mrb[12].mxu0 }
 0x59c   : > { %v2297_v11 = vpop.f32.mrb[13].mxu0  ;;  %2316 = vmatmul.mubr.msk.f32.vlgmr.msra.gmra.mrb[16].mxu0 %vm857_vm4, %v1431_v9 }
 0x59d   : > { %2331 = vmatprep.mubr.msk.f32.mxu0 %vm2528_vm1, %v2529_v18  ;;  %v2155_v11 = vld [vmem:[%s2983_s9] ss:$0 sm:$0xff] }
 0x59f   : > { %v1507_v12 = vpop.f32.mrb[8].mxu1 }
 0x5a0   : > { %v2302_v13 = vpop.f32.mrb[9].mxu1  ;;  %2321 = vmatmul.mubr.msk.f32.vlgmr.msra.gmra.mrb[12].mxu1 %vm857_vm4, %v1507_v12 }
 0x5a1   : > { %2350 = vmatprep.mubr.msk.f32.mxu1 %vm2528_vm1, %v2529_v18  ;;  %v2150_v18 = vld [vmem:[%s2979_s5] ss:$0 sm:$0xff]  ;;  %2385 = vmatpush3.bf16.msra.mxu1 %v2384_v46 }
 0x5a2   : > { %2386 = vmatprep.subr.bf16.mxu1 %v2527_v10 }
 0x5a5   : > { %2388 = vmatpush3.bf16.msra.mxu1 %v2387_v48 }
 0x5a6   : > { %2389 = vmatprep.subr.bf16.mxu1 %v2527_v10 }
 0x5a9   : > { %2391 = vmatpush3.bf16.msra.mxu1 %v2390_v51 }
 0x5aa   : > { %2392 = vmatprep.subr.bf16.mxu1 %v2527_v10 }
 0x5ad   : > { %2394 = vmatpush3.bf16.msra.mxu1 %v2393_v4 }
 0x667   : > { %v1584_v14 = vpop.f32.mrb[14].mxu0 }
 0x668   : > { %v2307_v15 = vpop.f32.mrb[15].mxu0  ;;  %v1807_v17 = vsel %vm483_vm0, %v1584_v14, 0.0 }
 0x66b   : > { %v1657_v16 = vpop.f32.mrb[10].mxu1 }
 0x66c   : > { %v1808_v19 = vsel %vm483_vm0, %v1657_v16, 0.0  ;;  %v2312_v20 = vpop.f32.mrb[11].mxu1 }
 0x66d   : > { %v1809_v21 = vadd.f32 %v1808_v19, %v1807_v17 }
 0x66f   : > { %v1730_v22 = vpop.f32.mrb[16].mxu0 }
 0x670   : > { %v1810_v23 = vsel %vm483_vm0, %v1730_v22, 0.0  ;;  %v2317_v24 = vpop.f32.mrb[17].mxu0 }
 0x671   : > { %v1811_v25 = vadd.f32 %v1810_v23, %v1809_v21 }
 0x673   : > { %v1803_v26 = vpop.f32.mrb[12].mxu1 }
 0x674   : > { %v1812_v27 = vsel %vm483_vm0, %v1803_v26, 0.0  ;;  %v2322_v28 = vpop.f32.mrb[13].mxu1 }
 0x675   : > { %v1813_v29 = vadd.f32 %v1812_v27, %v1811_v25 }
 0x677   : > { %v1821_v30 = vadd.f32 %v2150_v18, %v1813_v29 }
 0x679   : > { %v2866_v31 = vadd.f32 %v1821_v30, %v2664_v0  ;;  %v1861_v0 = vld [vmem:[%s2980_s6 + $0x8] sm:$0xff] }
 0x67a   : > { %v2378_v40 = vpack.c.bf16 %v1861_v0, %v1860_v38 }
 0x67b   : > { %v1825_v32 = vsel %vm483_vm0, %v2866_v31, 0.0 }
 0x67c   : > { %1826 = vadd.xlane.f32.xlu1 %v1825_v32  ;;  %2379 = vmatpush3.bf16.msra.mxu0 %v2378_v40 }
 0x67d   : > { %2380 = vmatprep.subr.bf16.mxu0 %v2527_v10  ;;  %v2152_v10 = vld [vmem:[%s2987_s13] ss:$0 sm:$0xff] }
 0x680   : > { %2382 = vmatpush3.bf16.msra.mxu0 %v2381_v42 }
 0x709   : > { %v1827_v33 = vpop.xlane.xlu1 %1826 }
 0x70a   : > { %v1828_v34 = vmul.f32 0.03125, %v1827_v33 }
 0x70c   : > { %v1829_v35 = vsub.f32 %v2866_v31, %v1828_v34 }
 0x70e   : > { %v1830_v36 = vmul.f32 %v1829_v35, %v1829_v35  ;;  %v1851_v61 = vmul.f32 %v2151_v60, %v1829_v35 }
 0x710   : > { %v1831_v37 = vsel %vm483_vm0, %v1830_v36, 0.0 }
 0x711   : > { %1832 = vadd.xlane.f32.xlu0 %v1831_v37 }
 0x79e   : > { %v1833_v52 = vpop.xlane.xlu0 %1832 }
 0x79f   : > { %v1834_v53 = vmul.f32 0.032258064, %v1833_v52 }
 0x7a1   : > { %2459 = vrsqrt.f32 %v1834_v53  ;;  %vm1837_vm6 = vcmp.eq.f32.partialorder %v1834_v53, inf  ;;  %v1840_v56 = vand.u32 2147483648, %v1834_v53  ;;  %vm1839_vm7 = vcmp.eq.f32.partialorder %v1834_v53, 0.0 }
 0x7ab   : > { %v2460_v54 = vpop.eup %2459 }
 0x7ac   : > { %v1836_v55 = vmul.f32 %v2460_v54, %v1834_v53 }
 0x7ae   : > { %v1838_v57 = vsel %vm1837_vm6, %v1834_v53, %v1836_v55 }
 0x7af   : > { %v1841_v58 = vsel %vm1839_vm7, %v1840_v56, %v1838_v57 }
 0x7b0   : > { %v1842_v59 = vadd.f32 1e-06, %v1841_v58 }
 0x7b2   : > { %2461 = vrcp.f32 %v1842_v59 }
 0x7bc   : > { %v2462_v62 = vpop.eup %2461 }
 0x7bd   : > { %v1852_v63 = vmul.f32 %v2462_v62, %v1851_v61 }
 0x7bf   : > { %v1859_v1 = vadd.f32 %v2152_v10, %v1852_v63 }
 0x7c1   : > { %2332 = vmatmul.mubr.msk.f32.vlgmr.msra.gmra.mrb[18].mxu0 %vm483_vm0, %v1859_v1 }
 0x894   : > { %v1940_v6 = vpop.f32.mrb[18].mxu0 }
 0x895   : > { %v1941_v7 = vadd.f32 %v2153_v5, %v1940_v6  ;;  %v2333_v8 = vpop.f32.mrb[19].mxu0 }
 0x897   : > { %v1944_v9 = vmax.f32 %v1941_v7, 0.0 }
 0x899   : > { %2351 = vmatmul.mubr.msk.f32.vlgmr.msra.gmra.mrb[14].mxu1 %vm1960_vm8, %v1944_v9 }
 0x96c   : > { %v2030_v12 = vpop.f32.mrb[14].mxu1 }
 0x96d   : > { %v2031_v13 = vadd.f32 %v2155_v11, %v2030_v12  ;;  %v2352_v14 = vpop.f32.mrb[15].mxu1 }
 0x96f   : > { %v2034_v15 = vadd.f32 %v2031_v13, %v2866_v31 }
 0x971   : > { %2035 = vst.msk [vmem:[%s469_s22] sm:$0xff] %vm483_vm0, %v2034_v15 }
 0x972   : > { %2476 = shalt.err (!%p2473_p3)
}
 0x973   : > { %s2477_s18 = scalar_lea.hbm %s2931_s26, 128  ;;  %s2481_s21 = scalar_lea.hbm %s2988_s14, 256 }
 0x974   : > { %p2478_p4 = scmp.ne.s32.totalorder %s2931_s26, %s2477_s18  ;;  %p2482_p9 = scmp.lt.u32.totalorder %s2931_s26, %s2988_s14 }
 0x975   : > { %p2483_p10 = scmp.lt.u32.totalorder %s2481_s21, %s2477_s18  ;;  %p2485_p12 = scmp.lt.u32.totalorder %s2477_s18, %s2931_s26 }
 0x976   : > { %p2479_p7 = pnand %p2478_p4, %p2646_p5 }
 0x977   : > { %p2484_p11 = por %p2483_p10, %p2482_p9 }
 0x978   : > { %p2480_p8 = pneg %p2479_p7 }
 0x979   : > { %p2486_p13 = por %p2485_p12, %p2484_p11 }
 0x97b   : > { %p2487_p0 = pnand %p2486_p13, %p2480_p8 }
 0x97d   : > { %2490 = shalt.err (!%p2487_p0)
}
 0x97e   : > { %2395 = dma.vmem_to_hbm [thread:$0]  (%p2646_p5), %s2933_s20, 128, %s2931_s26, %s2037_s28  }
 0x97f PF: > { %p2401_p1 = scmp.ge.s32.totalorder %s2525_s16, 2  ;;  %s2062_s17 = sand.u32 1, %s2513_s29  }
 0x980   : > { %s2063_s15 = scalar_lea.sflag [#allocation3], %s2062_s17 }
 0x981   : > { %p2398_p2 = pnand %p2401_p1, %p2650_p6 }
 0x983   : > { %2508 = dma.done.wait (!%p2398_p2), %s2063_s15, 128  }
 0x984   : > { %2510 = vsyncadd (!%p2398_p2), %s2063_s15, 4294967168  ;;  %s2999_s16 = sld [smem:[#allocation6_spill]]  ;;  %s3000_s25 = sld [smem:[#allocation5_spill]] }
 0x985   : > { %s3001_s15 = sld [smem:[#allocation7_spill]]  ;;  %s3002_s29 = smov %s2517_s30 }
 0x98a   : > { %p24_p3 = scmp.ge.s32.totalorder %s2999_s16, 4   ;;  %s3003_s30 = smov %s3000_s25 }
 0x98c   :  { %26 = sbr.rel (!%p24_p3) target bundleno = 5 (0x5), region = 114 }
 0x993   :  { %2068 = vsyncpa [#allocation3], 1 }
 0x994   :  { %2070 = vsyncpa [#allocation3 + $0x1], 1 }

</bundles_post_ra>
